<compile_context>
chip_gen: v7x
topology: tpu7x:2x2x1
jax: 0.10.0
libtpu: 0.0.40
codegen_flags: <defaults>
</compile_context>

<pallas_src>
import functools

import jax
import jax.numpy as jnp
from jax.experimental import pallas as pl
from jax.experimental.pallas import tpu as pltpu


def _constraint_kernel(lmbda_ref, value_ref, loss_ref, lmbda_out_ref, *, bound_sq):
    """One (batch, M) tile: project lmbda, then loss[b, m] = lmbda[b] . value[b, :, m]."""
    lm = lmbda_ref[...].astype(jnp.float32)                 # (Bt, K), K lane-contiguous

    # --- projection (the torch.no_grad block) --------------------------------
    # squared-norm compare (no sqrt): ||lm|| > bound  <=>  sum(lm^2) > bound^2
    sq = jnp.sum(lm * lm, axis=1, keepdims=True)            # (Bt, 1)
    mn = jnp.min(lm, axis=1, keepdims=True)                 # (Bt, 1)
    lm = jnp.where(sq > bound_sq, mn, lm)                   # min-fill when over bound
    lm = jnp.maximum(lm, 0.0)                               # clamp(min=0)
    lmbda_out_ref[...] = lm.astype(lmbda_out_ref.dtype)     # aliased with the input

    # --- loss = lmbda.T @ value  (K <= 8: keep on the VPU, not the MXU) -------
    v = value_ref[...].astype(jnp.float32)                  # (Bt, K, Tm), cast in-kernel
    loss_ref[...] = jnp.sum(lm[:, :, None] * v, axis=1).astype(loss_ref.dtype)


def _round_up(x, m):
    return ((x + m - 1) // m) * m


_VALUE_TILE_TARGET_BYTES = 4 * 1024 * 1024   # per-step value tile (x2 double-buffered)


def constraint_forward_batched(lmbda, value, bound_arg):
    """Batched functional Constraint forward.

    Args:
      lmbda: (B, K, 1) f32 -- B independent Constraint parameters.
      value: (B, K, M) -- any float dtype; streamed in native dtype.
      bound_arg: constructor arg; internal threshold is 1/bound_arg.
    Returns:
      loss:       (B, 1, M) f32
      lmbda_new:  (B, K, 1) f32  (the projected/clamped parameters)
    """
    B, K, _ = lmbda.shape
    M = value.shape[2]
    bound_sq = (1.0 / float(bound_arg)) ** 2

    # lane-contiguous lmbda layout: (B, K). This buffer is tiny (B*K floats).
    lm2d = lmbda.reshape(B, K).astype(jnp.float32)

    itemsize = jnp.dtype(value.dtype).itemsize

    # ---- M tiling: only tile when M is large; 128-multiple tiles, else the
    # full (possibly non-128) M as a single lane block (legal: full array dim).
    if M >= 256:
        tile_m = min(2048, (M // 128) * 128)
    else:
        tile_m = M
    nm = pl.cdiv(M, tile_m)

    # ---- batch tiling: ~4 MiB of value per step, sublane multiple of 8, and
    # at least 2 "parallel" batch steps when B > 8 (v7x megacore sharding).
    if B <= 8:
        tile_b = B                                   # full-dim block (legal)
    else:
        bytes_per_row = K * tile_m * itemsize
        rows_budget = max(8, (_VALUE_TILE_TARGET_BYTES // max(1, bytes_per_row)) // 8 * 8)
        half = _round_up(-(-B // 2), 8)              # ceil(B/2), rounded to 8
        tile_b = max(8, min(rows_budget, half, _round_up(B, 8)))
    nb = pl.cdiv(B, tile_b)

    loss, lmbda_new = pl.pallas_call(
        functools.partial(_constraint_kernel, bound_sq=bound_sq),
        out_shape=(
            jax.ShapeDtypeStruct((B, M), jnp.float32),
            jax.ShapeDtypeStruct((B, K), jnp.float32),
        ),
        grid=(nb, nm),
        in_specs=[
            pl.BlockSpec((tile_b, K), lambda b, m: (b, 0)),
            pl.BlockSpec((tile_b, K, tile_m), lambda b, m: (b, 0, m)),
        ],
        out_specs=(
            pl.BlockSpec((tile_b, tile_m), lambda b, m: (b, m)),
            pl.BlockSpec((tile_b, K), lambda b, m: (b, 0)),
        ),
        # lmbda input buffer is reused for the updated lmbda (in-place update).
        input_output_aliases={0: 1},
        compiler_params=pltpu.CompilerParams(
            dimension_semantics=("parallel", "arbitrary"),
            vmem_limit_bytes=32 * 1024 * 1024),
    )(lm2d, value)

    return loss.reshape(B, 1, M), lmbda_new.reshape(B, K, 1)


def constraint_forward(lmbda, value, bound_arg):
    """Single-instance Constraint forward: lmbda (K,1), value (K,M)."""
    loss, lm = constraint_forward_batched(lmbda[None], value[None], bound_arg)
    return loss[0], lm[0]


def _reference(lmbda, value, bound_arg):
    """Pure-JAX batched reference for correctness checking."""
    bound = 1.0 / float(bound_arg)
    norm = jnp.sqrt(jnp.sum(lmbda * lmbda, axis=(1, 2), keepdims=True))  # (B,1,1)
    mn = jnp.min(lmbda, axis=(1, 2), keepdims=True)                      # (B,1,1)
    lm = jnp.where(norm > bound, mn, lmbda)
    lm = jnp.maximum(lm, 0.0)
    loss = jnp.einsum("bkp,bkm->bpm", lm, value.astype(jnp.float32))     # (B,1,M)
    return loss, lm


if __name__ == "__main__":
    key = jax.random.PRNGKey(0)
    k_lmbda, k_value = jax.random.split(key)

    fair = "dp"                      # 'dp' -> K=4, 'eo' -> K=8
    K = 4 if fair == "dp" else 8
    M = 8                            # number of columns in `value`
    B = 16                           # 16 independent Constraint instances, ONE launch
    bound_arg = 0.5                  # Constraint(fair, bound=0.5) -> threshold 2.0

    # torch.rand((K, 1)) equivalent init per instance, deterministic.
    lmbda = jax.random.uniform(k_lmbda, (B, K, 1), dtype=jnp.float32)
    # scale half the batch above the bound so both projection branches
    # (min-fill vs. pass-through) are exercised.
    scale = jnp.where((jnp.arange(B) % 2 == 0)[:, None, None], 3.0, 1.0)
    lmbda = lmbda * scale
    value = jax.random.normal(k_value, (B, K, M), dtype=jnp.float32)

    loss, lmbda_new = constraint_forward_batched(lmbda, value, bound_arg)
    loss = jax.block_until_ready(loss)
    lmbda_new = jax.block_until_ready(lmbda_new)

    ref_loss, ref_lmbda = _reference(lmbda, value, bound_arg)
    assert loss.shape == (B, 1, M) and lmbda_new.shape == (B, K, 1)
    assert jnp.allclose(loss, ref_loss, atol=1e-5, rtol=1e-5)
    assert jnp.allclose(lmbda_new, ref_lmbda, atol=1e-6, rtol=1e-6)

    # single-instance path (exactly the original module's shapes).
    loss1, lm1 = constraint_forward(lmbda[0], value[0], bound_arg)
    loss1 = jax.block_until_ready(loss1)
    assert loss1.shape == (1, M) and lm1.shape == (K, 1)
    assert jnp.allclose(loss1, ref_loss[0], atol=1e-5, rtol=1e-5)
    assert jnp.allclose(lm1, ref_lmbda[0], atol=1e-6, rtol=1e-6)

    print("KERNEL_OK")
</pallas_src>

<mosaic_0001>
module attributes {stable_mosaic.version = 11 : i64} {
  func.func @_constraint_kernel(%arg0: i32, %arg1: i32, %arg2: memref<8x4xf32, #tpu.memory_space<vmem>>, %arg3: memref<8x4x8xf32, #tpu.memory_space<vmem>>, %arg4: memref<8x8xf32, #tpu.memory_space<vmem>>, %arg5: memref<8x4xf32, #tpu.memory_space<vmem>>) attributes {dimension_semantics = [#tpu.dimension_semantics<parallel>, #tpu.dimension_semantics<arbitrary>], iteration_bounds = array<i64: 2, 1>, scalar_prefetch = 0 : i64, scratch_operands = 0 : i64, tpu.core_type = #tpu.core_type<tc>, window_params = [{transform_indices = @transform_0, window_bounds = array<i64: 8, 4>}, {transform_indices = @transform_1, window_bounds = array<i64: 8, 4, 8>}, {transform_indices = @transform_2, window_bounds = array<i64: 8, 8>}, {transform_indices = @transform_3, window_bounds = array<i64: 8, 4>}]} {
    %c0 = arith.constant 0 : index
    %c0_0 = arith.constant 0 : index
    %0 = vector.load %arg2[%c0, %c0_0] : memref<8x4xf32, #tpu.memory_space<vmem>>, vector<8x4xf32>
    %1 = arith.mulf %0, %0 : vector<8x4xf32>
    %cst = arith.constant dense<0.000000e+00> : vector<8xf32>
    %2 = vector.multi_reduction <add>, %1, %cst [1] : vector<8x4xf32> to vector<8xf32>
    %3 = vector.shape_cast %2 : vector<8xf32> to vector<8x1xf32>
    %cst_1 = arith.constant dense<0x7F800000> : vector<8xf32>
    %4 = vector.multi_reduction <minimumf>, %0, %cst_1 [1] : vector<8x4xf32> to vector<8xf32>
    %5 = vector.shape_cast %4 : vector<8xf32> to vector<8x1xf32>
    %cst_2 = arith.constant 4.000000e+00 : f32
    %6 = vector.broadcast %cst_2 : f32 to vector<8x1xf32>
    %7 = arith.cmpf ogt, %3, %6 : vector<8x1xf32>
    %8 = vector.shape_cast %7 : vector<8x1xi1> to vector<8x1xi1>
    %9 = vector.broadcast %8 : vector<8x1xi1> to vector<8x4xi1>
    %10 = vector.shape_cast %5 : vector<8x1xf32> to vector<8x1xf32>
    %11 = vector.broadcast %10 : vector<8x1xf32> to vector<8x4xf32>
    %12 = arith.select %9, %11, %0 : vector<8x4xi1>, vector<8x4xf32>
    %cst_3 = arith.constant 0.000000e+00 : f32
    %13 = vector.broadcast %cst_3 : f32 to vector<8x4xf32>
    %14 = arith.maximumf %12, %13 : vector<8x4xf32>
    %c0_4 = arith.constant 0 : index
    %c0_5 = arith.constant 0 : index
    %15 = vector.load %arg5[%c0_4, %c0_5] : memref<8x4xf32, #tpu.memory_space<vmem>>, vector<8x4xf32>
    tpu.vector_store %arg5[%c0_4, %c0_5], %14 {strides = array<i32>} : memref<8x4xf32, #tpu.memory_space<vmem>>, vector<8x4xf32>,
    %c0_6 = arith.constant 0 : index
    %c0_7 = arith.constant 0 : index
    %c0_8 = arith.constant 0 : index
    %16 = vector.load %arg3[%c0_6, %c0_7, %c0_8] : memref<8x4x8xf32, #tpu.memory_space<vmem>>, vector<8x4x8xf32>
    %17 = vector.shape_cast %14 : vector<8x4xf32> to vector<8x4x1xf32>
    %18 = vector.broadcast %17 : vector<8x4x1xf32> to vector<8x4x8xf32>
    %19 = arith.mulf %18, %16 : vector<8x4x8xf32>
    %cst_9 = arith.constant dense<0.000000e+00> : vector<8x8xf32>
    %20 = vector.multi_reduction <add>, %19, %cst_9 [1] : vector<8x4x8xf32> to vector<8x8xf32>
    %c0_10 = arith.constant 0 : index
    %c0_11 = arith.constant 0 : index
    %21 = vector.load %arg4[%c0_10, %c0_11] : memref<8x8xf32, #tpu.memory_space<vmem>>, vector<8x8xf32>
    tpu.vector_store %arg4[%c0_10, %c0_11], %20 {strides = array<i32>} : memref<8x8xf32, #tpu.memory_space<vmem>>, vector<8x8xf32>,
    return
  }
  func.func @transform_0(%arg0: i32, %arg1: i32) -> (i32, i32) {
    %c0_i32 = arith.constant 0 : i32
    %c0_i32_0 = arith.constant 0 : i32
    return %arg0, %c0_i32 : i32, i32
  }
  func.func @transform_1(%arg0: i32, %arg1: i32) -> (i32, i32, i32) {
    %c0_i32 = arith.constant 0 : i32
    %c0_i32_0 = arith.constant 0 : i32
    return %arg0, %c0_i32, %arg1 : i32, i32, i32
  }
  func.func @transform_2(%arg0: i32, %arg1: i32) -> (i32, i32) {
    %c0_i32 = arith.constant 0 : i32
    return %arg0, %arg1 : i32, i32
  }
  func.func @transform_3(%arg0: i32, %arg1: i32) -> (i32, i32) {
    %c0_i32 = arith.constant 0 : i32
    %c0_i32_0 = arith.constant 0 : i32
    return %arg0, %c0_i32 : i32, i32
  }
}

</mosaic_0001>

<bundles_post_ra>
// kernel: tpu_custom_call.1
= control target key start
LH: loop header
LB: loop body
LE: loop exit
PB: predicated region body
PF: predicated region fallthrough
CT: control target
= control target key end

     0   :  { %s596_s12 = smov 0   ;;  %s598_s13 = smov 0   ;;  %s666_s0 = inlined_call_operand.vmem [shape: f32[16,4], index: 0, kind: input, shape index: {}, may-alias: {0,3}]   ;;  %s667_s1 = inlined_call_operand.vmem [shape: f32[16,4,8], index: 1, kind: input, shape index: {}]   ;;  %s668_s2 = inlined_call_operand.vmem [shape: f32[16,8], index: 2, kind: output, shape index: {0}]   ;;  %s669_s3 = inlined_call_operand.vmem [shape: f32[16,4], index: 3, kind: output, shape index: {1}, may-alias: {0,3}]  }
   0x1   :  { %s600_s14 = smov 0  }
   0x2 LB: > { %s26_s15 = sadd.s32 1, %s570_s13  ;;  %p520_p0 = scmp.ge.s32.totalorder %s574_s14, 1  ;;  %s574_s14 = sphi %s600_s14, %s14_s14   ;;  %s570_s13 = sphi %s598_s13, %s671_s13   ;;  %s566_s12 = sphi %s596_s12, %s670_s12  }
   0x3   : > { %p28_p1 = scmp.ge.s32.totalorder %s26_s15, 2  ;;  %p169_p2 = scmp.lt.s32.totalorder %s574_s14, 3 }
   0x5   : > { %s673_s15 = smov (%p28_p1, %s26_s15), 0  ;;  %p170_p3 = pnand %p520_p0, %p169_p2 }
   0x6   : > { %p206_p4 = scmp.lt.s32.totalorder (!%p170_p3), %s566_s12, 1  ;;  %vm232_vm0 = vcmask (!%p170_p3), 31744   ;;  %v253_v4 = vlaneseq (!%p170_p3)  ;;  %s522_s24 = sshll.u32 (!%p170_p3), %s566_s12, 3  ;;  %vm317_vm2 = vcmask (!%p170_p3), 60416   ;;  %vm382_vm3 = vcmask (!%p170_p3), 1041409  }
   0x7   : > { %173 = sbr.rel (%p170_p3) target bundleno = 329 (0x149), region = 28  ;;  %p211_p5 = scmp.lt.s32.totalorder (!%p170_p3), %s522_s24, 15  ;;  %vm384_vm4 = vcmask (!%p170_p3), 1042434   ;;  %vm386_vm5 = vcmask (!%p170_p3), 1043459   ;;  %vm388_vm6 = vcmask (!%p170_p3), 1044484   ;;  %vm390_vm7 = vcmask (!%p170_p3), 1045509  }
   0x8   : > { %v254_v6 = vshrl.u32 (!%p170_p3), %v253_v4, 7  ;;  %vm392_vm8 = vcmask (!%p170_p3), 1046534   ;;  %vm394_vm9 = vcmask (!%p170_p3), 1047559   ;;  %vm397_vm10 = vcmask (!%p170_p3), 64512  }
   0xa   : > { %v269_v8 = vsub.s32 (!%p170_p3), 2, %v254_v6  ;;  %v255_v9 = vsub.s32 (!%p170_p3), 0, %v254_v6  ;;  %v262_v14 = vsub.s32 (!%p170_p3), 1, %v254_v6  ;;  %v276_v16 = vsub.s32 (!%p170_p3), 3, %v254_v6 }
   0xb   : > { %v283_v18 = vsub.s32 (!%p170_p3), 4, %v254_v6  ;;  %v290_v20 = vsub.s32 (!%p170_p3), 5, %v254_v6  ;;  %v297_v22 = vsub.s32 (!%p170_p3), 6, %v254_v6  ;;  %v304_v24 = vsub.s32 (!%p170_p3), 7, %v254_v6 }
   0xe   : > { %s207_s16 = scalar_select %p206_p4, %s566_s12, 1 }
   0xf   : > { %s675_s24 = smov (!%p211_p5, %s522_s24), 15 }
  0x10   : > { %s618_s17 = sshll.u32 %s207_s16, 3  ;;  %s523_s25 = sshll.u32 %s675_s24, 2 }
  0x11   : > { %s209_s20 = scalar_lea.vmem %s666_s0, %s618_s17  ;;  %s229_s23 = scalar_lea.vmem %s669_s3, %s618_s17 }
  0x12   : > { %v230_v0 = vld [vmem:[%s209_s20] sm:$0xff]  ;;  %s635_s28 = scalar_lea.vmem %s667_s1, %s523_s25  ;;  %s225_s4 = scalar_lea.vmem %s668_s2, %s618_s17 }
  0x13   : > { %v231_v1 = vmul.f32 %v230_v0, %v230_v0  ;;  %v236_v3 = vsel %vm232_vm0, %v230_v0, inf  ;;  %v245_v26 = vld [vmem:[%s635_s28] sm:$0xf]  ;;  %v246_v28 = vld [vmem:[%s635_s28 + $0x4] sm:$0xf] }
  0x14   : > { %v247_v29 = vld [vmem:[%s635_s28 + $0x8] sm:$0xf]  ;;  %v248_v35 = vld [vmem:[%s635_s28 + $0xc] sm:$0xf]  ;;  %v249_v43 = vld [vmem:[%s635_s28 + $0x10] sm:$0xf] }
  0x15   : > { %v233_v2 = vsel %vm232_vm0, %v231_v1, 0.0  ;;  %v250_v51 = vld [vmem:[%s635_s28 + $0x14] sm:$0xf]  ;;  %v251_v61 = vld [vmem:[%s635_s28 + $0x18] sm:$0xf] }
  0x16   : > { %234 = vadd.xlane.f32.xlu0 %v233_v2 }
  0x1a   : > { %237 = vmin.xlane.f32.xlu0 %v236_v3 }
  0xa3   : > { %v235_v5 = vpop.xlane.xlu0 %234 }
  0xa4   : > { %vm239_vm1 = vcmp.gt.f32.partialorder %v235_v5, 4.0 }
  0xa7   : > { %v238_v7 = vpop.xlane.xlu0 %237 }
  0xa8   : > { %v242_v10 = vsel %vm239_vm1, %v238_v7, %v230_v0 }
  0xa9   : > { %v243_v11 = vmax.f32 %v242_v10, 0.0 }
  0xab   : > { %244 = vst.msk [vmem:[%s229_s23] sm:$0xff] %vm232_vm0, %v243_v11  ;;  %v270_v12 = vrot.slane %v243_v11, %v269_v8  ;;  %v256_v13 = vrot.slane %v243_v11, %v255_v9  ;;  %v263_v15 = vrot.slane %v243_v11, %v262_v14  ;;  %v277_v17 = vrot.slane %v243_v11, %v276_v16  ;;  %v252_v8 = vld [vmem:[%s635_s28 + $0x1c] sm:$0xf] }
  0xac   : > { %v284_v19 = vrot.slane %v243_v11, %v283_v18  ;;  %v291_v21 = vrot.slane %v243_v11, %v290_v20  ;;  %v298_v23 = vrot.slane %v243_v11, %v297_v22  ;;  %v305_v25 = vrot.slane %v243_v11, %v304_v24 }
  0xad   : > { %272 = vbcast.lane.b32.xlu0 %v270_v12, 256  ;;  %258 = vbcast.lane.b32.xlu1 %v256_v13, 256 }
  0xb1   : > { %265 = vbcast.lane.b32.xlu1 %v263_v15, 256 }
  0xb5   : > { %279 = vbcast.lane.b32.xlu1 %v277_v17, 256 }
  0xb9   : > { %286 = vbcast.lane.b32.xlu1 %v284_v19, 256 }
  0xbd   : > { %293 = vbcast.lane.b32.xlu1 %v291_v21, 256 }
  0xc1   : > { %300 = vbcast.lane.b32.xlu1 %v298_v23, 256 }
  0xc5   : > { %307 = vbcast.lane.b32.xlu1 %v305_v25, 256 }
 0x11f   : > { %v259_v27 = vpop.permute.xlu1 %258  ;;  %v273_v30 = vpop.permute.xlu0 %272 }
 0x120   : > { %v309_v31 = vmul.f32 %v259_v27, %v245_v26  ;;  %v311_v34 = vmul.f32 %v273_v30, %v247_v29 }
 0x122   : > { %v318_v36 = vsel %vm317_vm2, %v309_v31, 0.0  ;;  %v332_v41 = vsel %vm317_vm2, %v311_v34, 0.0 }
 0x123   : > { %v266_v32 = vpop.permute.xlu1 %265  ;;  %v319_v42 = vrot.slane %v318_v36, 4  ;;  %v333_v48 = vrot.slane %v332_v41, 4 }
 0x124   : > { %v310_v33 = vmul.f32 %v266_v32, %v246_v28 }
 0x125   : > { %v320_v50 = vadd.f32 %v319_v42, %v318_v36  ;;  %v334_v57 = vadd.f32 %v333_v48, %v332_v41 }
 0x126   : > { %v325_v37 = vsel %vm317_vm2, %v310_v33, 0.0 }
 0x127   : > { %v326_v38 = vrot.slane %v325_v37, 4  ;;  %v280_v39 = vpop.permute.xlu1 %279  ;;  %v321_v59 = vrot.slane %v320_v50, 2  ;;  %v335_v3 = vrot.slane %v334_v57, 2 }
 0x128   : > { %v312_v40 = vmul.f32 %v280_v39, %v248_v35 }
 0x129   : > { %v327_v45 = vadd.f32 %v326_v38, %v325_v37  ;;  %v322_v6 = vadd.f32 %v321_v59, %v320_v50  ;;  %v336_v15 = vadd.f32 %v335_v3, %v334_v57 }
 0x12a   : > { %v339_v44 = vsel %vm317_vm2, %v312_v40, 0.0 }
 0x12b   : > { %v340_v46 = vrot.slane %v339_v44, 4  ;;  %v287_v47 = vpop.permute.xlu1 %286  ;;  %v328_v53 = vrot.slane %v327_v45, 2  ;;  %v323_v18 = vrot.slane %v322_v6, 1  ;;  %v337_v26 = vrot.slane %v336_v15, 1 }
 0x12c   : > { %v313_v49 = vmul.f32 %v287_v47, %v249_v43 }
 0x12d   : > { %v341_v54 = vadd.f32 %v340_v46, %v339_v44  ;;  %v329_v63 = vadd.f32 %v328_v53, %v327_v45  ;;  %v324_v28 = vadd.f32 %v323_v18, %v322_v6  ;;  %v338_v36 = vadd.f32 %v337_v26, %v336_v15 }
 0x12e   : > { %v346_v52 = vsel %vm317_vm2, %v313_v49, 0.0 }
 0x12f   : > { %v347_v55 = vrot.slane %v346_v52, 4  ;;  %v294_v56 = vpop.permute.xlu1 %293  ;;  %v342_v0 = vrot.slane %v341_v54, 2  ;;  %v330_v10 = vrot.slane %v329_v63, 1 }
 0x130   : > { %v314_v58 = vmul.f32 %v294_v56, %v250_v51 }
 0x131   : > { %v348_v60 = vadd.f32 %v347_v55, %v346_v52  ;;  %v343_v11 = vadd.f32 %v342_v0, %v341_v54  ;;  %v331_v22 = vadd.f32 %v330_v10, %v329_v63 }
 0x132   : > { %v353_v62 = vsel %vm317_vm2, %v314_v58, 0.0 }
 0x133   : > { %v354_v1 = vrot.slane %v353_v62, 4  ;;  %v301_v2 = vpop.permute.xlu1 %300  ;;  %v349_v4 = vrot.slane %v348_v60, 2  ;;  %v344_v23 = vrot.slane %v343_v11, 1  ;;  %v383_v32 = vsel %vm382_vm3, %v331_v22, %v324_v28 }
 0x134   : > { %v315_v5 = vmul.f32 %v301_v2, %v251_v61  ;;  %v385_v40 = vsel %vm384_vm4, %v338_v36, %v383_v32 }
 0x135   : > { %v355_v7 = vadd.f32 %v354_v1, %v353_v62  ;;  %v350_v16 = vadd.f32 %v349_v4, %v348_v60  ;;  %v345_v33 = vadd.f32 %v344_v23, %v343_v11 }
 0x136   : > { %v360_v9 = vsel %vm317_vm2, %v315_v5, 0.0 }
 0x137   : > { %v356_v12 = vrot.slane %v355_v7, 2  ;;  %v361_v13 = vrot.slane %v360_v9, 4  ;;  %v308_v14 = vpop.permute.xlu1 %307  ;;  %v351_v27 = vrot.slane %v350_v16, 1  ;;  %v387_v42 = vsel %vm386_vm5, %v345_v33, %v385_v40 }
 0x138   : > { %v316_v17 = vmul.f32 %v308_v14, %v252_v8 }
 0x139   : > { %v357_v19 = vadd.f32 %v356_v12, %v355_v7  ;;  %v362_v20 = vadd.f32 %v361_v13, %v360_v9  ;;  %v352_v37 = vadd.f32 %v351_v27, %v350_v16 }
 0x13a   : > { %v367_v21 = vsel %vm317_vm2, %v316_v17, 0.0 }
 0x13b   : > { %v363_v24 = vrot.slane %v362_v20, 2  ;;  %v368_v25 = vrot.slane %v367_v21, 4  ;;  %v358_v29 = vrot.slane %v357_v19, 1  ;;  %v389_v44 = vsel %vm388_vm6, %v352_v37, %v387_v42 }
 0x13d   : > { %v364_v30 = vadd.f32 %v363_v24, %v362_v20  ;;  %v369_v31 = vadd.f32 %v368_v25, %v367_v21  ;;  %v359_v38 = vadd.f32 %v358_v29, %v357_v19 }
 0x13f   : > { %v365_v34 = vrot.slane %v364_v30, 1  ;;  %v370_v35 = vrot.slane %v369_v31, 2  ;;  %v391_v45 = vsel %vm390_vm7, %v359_v38, %v389_v44 }
 0x141   : > { %v371_v39 = vadd.f32 %v370_v35, %v369_v31  ;;  %v366_v41 = vadd.f32 %v365_v34, %v364_v30 }
 0x143   : > { %v372_v43 = vrot.slane %v371_v39, 1  ;;  %v393_v47 = vsel %vm392_vm8, %v366_v41, %v391_v45 }
 0x145   : > { %v373_v46 = vadd.f32 %v372_v43, %v371_v39 }
 0x147   : > { %v395_v48 = vsel %vm394_vm9, %v373_v46, %v393_v47 }
 0x148   : > { %398 = vst.msk [vmem:[%s225_s4] sm:$0xff] %vm397_vm10, %v395_v48 }
 0x149 PF: > { %s14_s14 = sadd.s32 1, %s574_s14   ;;  %s670_s12 = smov %s570_s13 }
 0x14a   : > { %p11_p6 = scmp.ge.s32.totalorder %s14_s14, 4   ;;  %s671_s13 = smov %s673_s15 }
 0x14c   :  { %13 = sbr.rel (!%p11_p6) target bundleno = 2 (0x2), region = 73 }

</bundles_post_ra>
